<compile_context>
chip_gen: v7x
topology: tpu7x:2x2x1
jax: 0.10.0
libtpu: 0.0.40
codegen_flags: <defaults>
</compile_context>

<pallas_src>
import functools
import math

import jax
import jax.numpy as jnp
from jax.experimental import pallas as pl
from jax.experimental.pallas import tpu as pltpu


def _round_up(a, m):
    return (a + m - 1) // m * m


def _nbytes(shape, dtype):
    return math.prod(shape) * jnp.dtype(dtype).itemsize


# -------------------------------------------------------------------------
# Pallas kernel factory: GCN + residual + action-weighted readout + MLP -> Q
# -------------------------------------------------------------------------
def make_gnn_critic1_kernel(C, H, off_wg, off_w1, off_w2):
    f32 = jnp.float32
    bf16 = jnp.bfloat16

    def kernel(adj_ref, x_ref, wact_ref, wslab_ref, fslab_ref, q_ref):
        x = x_ref[...]                                   # (NG, C) f32, all graphs of this step

        # Unpack packed constant slabs (static slices of VMEM-resident values).
        wslab = wslab_ref[...]                           # bf16 weight slab
        fslab = fslab_ref[...]                           # f32 bias/head slab
        wg = wslab[off_wg:off_wg + C, 0:C]               # (C, C)
        w1 = wslab[off_w1:off_w1 + C, 0:H]               # (C, H)
        w2 = wslab[off_w2:off_w2 + H, 0:H]               # (H, H)
        bg = fslab[0:1, 0:C]                             # (1, C)
        b1 = fslab[1:2, 0:H]                             # (1, H)
        b2 = fslab[2:3, 0:H]                             # (1, H)
        w3 = fslab[3:4, 0:H]                             # (1, H)  lin3.weight row
        b3 = fslab[4:5, 0:1]                             # (1, 1)

        # --- GCNConv: relu(A_norm @ (X @ Wg) + bg)  (bf16 MXU, f32 accumulation) ---
        xw = jnp.dot(x.astype(bf16), wg, preferred_element_type=f32)               # (NG, C)
        h = jnp.dot(adj_ref[...], xw.astype(bf16), preferred_element_type=f32)     # (NG, C)
        z = jnp.maximum(h + bg, 0.0) + x                                            # residual

        # --- action-weighted readout as one block-diagonal matmul ---
        # wact[g, n] = 10*action[g, a] iff node n is slot a of graph g, else 0.
        pooled = jnp.dot(wact_ref[...], z.astype(bf16), preferred_element_type=f32)  # (GB, C)

        # --- MLP head ---
        a1 = jnp.maximum(
            jnp.dot(pooled.astype(bf16), w1, preferred_element_type=f32) + b1, 0.0)  # (GB, H)
        a2 = jnp.maximum(
            jnp.dot(a1.astype(bf16), w2, preferred_element_type=f32) + b2, 0.0)      # (GB, H)

        # lin3 (H -> 1): VPU multiply + lane reduce (no 1-lane MXU result tile).
        q = jnp.sum(a2 * w3, axis=-1, keepdims=True) + b3                            # (GB, 1)

        # Single lane-major writeback for all graphs of this step.
        q_ref[...] = jnp.transpose(q)[None]                                          # (1, 1, GB)

    return kernel


# -------------------------------------------------------------------------
# Wrapper: one (or two, for v7x) fat grid steps covering all critic evaluations
# -------------------------------------------------------------------------
def gnn_critic1_forward(adj_bf16, state_flat, w_act_bf16, w_slab, f_slab, *,
                        hidden_size, offsets, grid_steps=1):
    """adj_bf16: (NG, NG) bf16 normalized adjacency of ONE step group (shared across steps);
       state_flat: (grid_steps*NG, C) f32; w_act_bf16: (grid_steps*GB, NG) bf16 readout rows;
       w_slab: packed bf16 weights; f_slab: packed f32 biases/head."""
    ng = adj_bf16.shape[0]
    total_nodes, c = state_flat.shape
    assert total_nodes == grid_steps * ng
    total_graphs = w_act_bf16.shape[0]
    gb = total_graphs // grid_steps
    h = hidden_size
    off_wg, off_w1, off_w2 = offsets

    in_specs = [
        pl.BlockSpec((ng, ng), lambda s: (0, 0)),          # adjacency (bf16), VMEM-resident
        pl.BlockSpec((ng, c), lambda s: (s, 0)),           # stacked node features (f32)
        pl.BlockSpec((gb, ng), lambda s: (s, 0)),          # precomputed action readout rows (bf16)
        pl.BlockSpec(w_slab.shape, lambda s: (0, 0)),      # packed bf16 weights, VMEM-resident
        pl.BlockSpec(f_slab.shape, lambda s: (0, 0)),      # packed f32 biases/head, VMEM-resident
    ]
    out_specs = pl.BlockSpec((1, 1, gb), lambda s: (s, 0, 0))

    # vmem limit derived from actual footprint (x4 for double-buffering + headroom).
    footprint = (_nbytes((ng, ng), jnp.bfloat16) + _nbytes((ng, c), jnp.float32)
                 + _nbytes((gb, ng), jnp.bfloat16) + _nbytes(w_slab.shape, jnp.bfloat16)
                 + _nbytes(f_slab.shape, jnp.float32) + _nbytes((1, 1, gb), jnp.float32))
    vmem_limit = min(max(4 * footprint + (2 << 20), 8 << 20), 64 << 20)

    grid_spec = pltpu.PrefetchScalarGridSpec(
        num_scalar_prefetch=0,
        grid=(grid_steps,),
        in_specs=in_specs,
        out_specs=out_specs,
    )

    q = pl.pallas_call(
        make_gnn_critic1_kernel(c, h, off_wg, off_w1, off_w2),
        out_shape=jax.ShapeDtypeStruct((grid_steps, 1, gb), jnp.float32),
        grid_spec=grid_spec,
        compiler_params=pltpu.CompilerParams(
            dimension_semantics=("parallel",),   # grid_steps=2 feeds both TCs on v7x
            vmem_limit_bytes=int(vmem_limit),
        ),
    )(adj_bf16, state_flat, w_act_bf16, w_slab, f_slab)
    return q.reshape(total_graphs)


def gnn_critic1_apply(adj_bf16, state_flat, action, w_slab, f_slab, *,
                      act_dim, hidden_size, offsets, grid_steps=1):
    """Full forward: build the action-weighted readout rows in plain XLA, then call the kernel."""
    w_act = build_w_act(action, act_dim, grid_steps)
    return gnn_critic1_forward(adj_bf16, state_flat, w_act, w_slab, f_slab,
                               hidden_size=hidden_size, offsets=offsets,
                               grid_steps=grid_steps)


# -------------------------------------------------------------------------
# Plain-JAX glue
# -------------------------------------------------------------------------
def build_w_act(action, act_dim, grid_steps):
    """w_act[g, n] = 10*action[g, a] iff local node n is slot a of graph g (block-diagonal rows)."""
    total_graphs = action.shape[0]
    gb = total_graphs // grid_steps
    ng = gb * act_dim
    scaled = (action * 10.0).reshape(grid_steps, gb, act_dim)
    blocks = jnp.zeros((grid_steps, gb, gb, act_dim), jnp.float32)
    idx = jnp.arange(gb)
    blocks = blocks.at[:, idx, idx, :].set(scaled)
    return blocks.reshape(total_graphs, ng).astype(jnp.bfloat16)


def gcn_norm_dense(edge_index, num_nodes):
    """Dense D^-1/2 (A + I) D^-1/2 with A[dst, src] = 1 (PyG GCNConv convention)."""
    src = edge_index[0]
    dst = edge_index[1]
    a = jnp.zeros((num_nodes, num_nodes), jnp.float32)
    a = a.at[dst, src].set(1.0)
    a = a + jnp.eye(num_nodes, dtype=jnp.float32)
    deg = a.sum(axis=1)
    dinv = jnp.where(deg > 0.0, 1.0 / jnp.sqrt(deg), 0.0)
    return dinv[:, None] * a * dinv[None, :]


def init_params(key, in_channels, hidden_size):
    ks = jax.random.split(key, 8)
    s = 0.1
    return {
        "wg": (s * jax.random.normal(ks[0], (in_channels, in_channels))).astype(jnp.bfloat16),
        "bg": s * jax.random.normal(ks[1], (1, in_channels), jnp.float32),
        "w1": (s * jax.random.normal(ks[2], (in_channels, hidden_size))).astype(jnp.bfloat16),
        "b1": s * jax.random.normal(ks[3], (1, hidden_size), jnp.float32),
        "w2": (s * jax.random.normal(ks[4], (hidden_size, hidden_size))).astype(jnp.bfloat16),
        "b2": s * jax.random.normal(ks[5], (1, hidden_size), jnp.float32),
        "w3": s * jax.random.normal(ks[6], (1, hidden_size), jnp.float32),   # lin3.weight row
        "b3": s * jax.random.normal(ks[7], (1, 1), jnp.float32),
    }


def pack_weight_slab(wg, w1, w2):
    """Pack Wg / W1 / W2 into one sublane-aligned bf16 slab; returns (slab, row offsets)."""
    c = wg.shape[0]
    h = w2.shape[0]
    off_wg = 0
    off_w1 = _round_up(c, 8)
    off_w2 = off_w1 + _round_up(c, 8)
    rows = _round_up(off_w2 + h, 8)
    cols = max(c, h)
    slab = jnp.zeros((rows, cols), jnp.bfloat16)
    slab = slab.at[off_wg:off_wg + c, 0:c].set(wg.astype(jnp.bfloat16))
    slab = slab.at[off_w1:off_w1 + c, 0:h].set(w1.astype(jnp.bfloat16))
    slab = slab.at[off_w2:off_w2 + h, 0:h].set(w2.astype(jnp.bfloat16))
    return slab, (off_wg, off_w1, off_w2)


def pack_f32_slab(bg, b1, b2, w3, b3, in_channels, hidden_size):
    """Pack bg / b1 / b2 / w3 / b3 into one (8, max(C,H)) f32 slab (row-per-tensor)."""
    cols = max(in_channels, hidden_size)
    slab = jnp.zeros((8, cols), jnp.float32)
    slab = slab.at[0, 0:in_channels].set(bg.reshape(-1))
    slab = slab.at[1, 0:hidden_size].set(b1.reshape(-1))
    slab = slab.at[2, 0:hidden_size].set(b2.reshape(-1))
    slab = slab.at[3, 0:hidden_size].set(w3.reshape(-1))
    slab = slab.at[4, 0].set(b3.reshape(())[()])
    return slab


# -------------------------------------------------------------------------
# Pure-JAX reference (mirrors the module semantics + the kernel's bf16/f32 mix)
# -------------------------------------------------------------------------
def gnn_critic1_reference(adj_bf16, state_flat, action, params, act_dim, grid_steps):
    f32, bf16 = jnp.float32, jnp.bfloat16
    ng = adj_bf16.shape[0]
    total_nodes, c = state_flat.shape
    xs = state_flat.reshape(grid_steps, ng, c)

    def per_step(x):
        xw = jnp.dot(x.astype(bf16), params["wg"], preferred_element_type=f32)
        h = jnp.dot(adj_bf16, xw.astype(bf16), preferred_element_type=f32)
        h = jnp.maximum(h + params["bg"], 0.0)
        return h + x

    z = jax.vmap(per_step)(xs).reshape(total_nodes, c)
    zr = z.reshape(-1, act_dim, c)                                      # (G*B, act_dim, C)
    aw = (action * 10.0)[..., None]                                     # (G*B, act_dim, 1)
    pooled = jnp.sum(zr.astype(bf16).astype(f32) * aw.astype(bf16).astype(f32), axis=1)
    a1 = jnp.maximum(jnp.dot(pooled.astype(bf16), params["w1"],
                             preferred_element_type=f32) + params["b1"], 0.0)
    a2 = jnp.maximum(jnp.dot(a1.astype(bf16), params["w2"],
                             preferred_element_type=f32) + params["b2"], 0.0)
    return jnp.sum(a2 * params["w3"], axis=-1) + params["b3"][0, 0]


if __name__ == "__main__":
    # Small shapes consistent with the module.
    in_channels = 4
    hidden_size = 32
    act_dim = 6
    total_graphs = 32          # all critic evaluations folded into the matmul dimensions
    grid_steps = 1             # single fat step for v5e/v6e; set 2 on v7x to use both TCs
    gb = total_graphs // grid_steps
    ng = gb * act_dim          # nodes handled per grid step
    total_nodes = total_graphs * act_dim

    key = jax.random.PRNGKey(0)
    k_state, k_action, k_params = jax.random.split(key, 3)

    # node features (total_nodes, C) and simplex-like actions (total_graphs, act_dim)
    state = jax.random.normal(k_state, (total_nodes, in_channels), jnp.float32)
    action = jax.nn.softmax(
        jax.random.normal(k_action, (total_graphs, act_dim), jnp.float32), axis=-1)

    # static topology: bidirectional ring inside each graph of `act_dim` nodes
    # (built for one step group; identical topology per group -> adjacency shared across steps)
    src_list, dst_list = [], []
    for b in range(gb):
        base = b * act_dim
        for i in range(act_dim):
            j = (i + 1) % act_dim
            src_list += [base + i, base + j]
            dst_list += [base + j, base + i]
    edge_index = jnp.array([src_list, dst_list], dtype=jnp.int32)

    # precomputed once per static topology / parameter set, reused every forward call
    adj_bf16 = gcn_norm_dense(edge_index, ng).astype(jnp.bfloat16)
    params = init_params(k_params, in_channels, hidden_size)
    w_slab, offsets = pack_weight_slab(params["wg"], params["w1"], params["w2"])
    f_slab = pack_f32_slab(params["bg"], params["b1"], params["b2"],
                           params["w3"], params["b3"], in_channels, hidden_size)

    forward = jax.jit(functools.partial(
        gnn_critic1_apply, act_dim=act_dim, hidden_size=hidden_size,
        offsets=offsets, grid_steps=grid_steps))

    q = forward(adj_bf16, state, action, w_slab, f_slab)
    jax.block_until_ready(q)

    q_ref = gnn_critic1_reference(adj_bf16, state, action, params, act_dim, grid_steps)

    assert q.shape == (total_graphs,)
    assert bool(jnp.all(jnp.isfinite(q)))
    assert bool(jnp.allclose(q, q_ref, rtol=1e-2, atol=1e-2)), (q, q_ref)

    print("KERNEL_OK")
</pallas_src>

<mosaic_0001>
module attributes {stable_mosaic.version = 11 : i64} {
  func.func @kernel(%arg0: i32, %arg1: memref<192x192xbf16, #tpu.memory_space<vmem>>, %arg2: memref<192x4xf32, #tpu.memory_space<vmem>>, %arg3: memref<32x192xbf16, #tpu.memory_space<vmem>>, %arg4: memref<48x32xbf16, #tpu.memory_space<vmem>>, %arg5: memref<8x32xf32, #tpu.memory_space<vmem>>, %arg6: memref<1x1x32xf32, #tpu.memory_space<vmem>>) attributes {dimension_semantics = [#tpu.dimension_semantics<parallel>], iteration_bounds = array<i64: 1>, scalar_prefetch = 0 : i64, scratch_operands = 0 : i64, tpu.core_type = #tpu.core_type<tc>, window_params = [{pipeline_mode = #tpu.pipeline_mode<synchronous>, transform_indices = @transform_0, window_bounds = array<i64: 192, 192>}, {transform_indices = @transform_1, window_bounds = array<i64: 192, 4>}, {transform_indices = @transform_2, window_bounds = array<i64: 32, 192>}, {pipeline_mode = #tpu.pipeline_mode<synchronous>, transform_indices = @transform_3, window_bounds = array<i64: 48, 32>}, {pipeline_mode = #tpu.pipeline_mode<synchronous>, transform_indices = @transform_4, window_bounds = array<i64: 8, 32>}, {transform_indices = @transform_5, window_bounds = array<i64: 1, 1, 32>}]} {
    %c0 = arith.constant 0 : index
    %c0_0 = arith.constant 0 : index
    %0 = vector.load %arg2[%c0, %c0_0] : memref<192x4xf32, #tpu.memory_space<vmem>>, vector<192x4xf32>
    %c0_1 = arith.constant 0 : index
    %c0_2 = arith.constant 0 : index
    %1 = vector.load %arg4[%c0_1, %c0_2] : memref<48x32xbf16, #tpu.memory_space<vmem>>, vector<48x32xbf16>
    %c0_3 = arith.constant 0 : index
    %c0_4 = arith.constant 0 : index
    %2 = vector.load %arg5[%c0_3, %c0_4] : memref<8x32xf32, #tpu.memory_space<vmem>>, vector<8x32xf32>
    %3 = vector.extract_strided_slice %1 {offsets = [0, 0], sizes = [4, 4], strides = [1, 1]} : vector<48x32xbf16> to vector<4x4xbf16>
    %4 = vector.extract_strided_slice %1 {offsets = [8, 0], sizes = [4, 32], strides = [1, 1]} : vector<48x32xbf16> to vector<4x32xbf16>
    %5 = vector.extract_strided_slice %1 {offsets = [16, 0], sizes = [32, 32], strides = [1, 1]} : vector<48x32xbf16> to vector<32x32xbf16>
    %6 = vector.extract_strided_slice %2 {offsets = [0, 0], sizes = [1, 4], strides = [1, 1]} : vector<8x32xf32> to vector<1x4xf32>
    %7 = vector.extract_strided_slice %2 {offsets = [1, 0], sizes = [1, 32], strides = [1, 1]} : vector<8x32xf32> to vector<1x32xf32>
    %8 = vector.extract_strided_slice %2 {offsets = [2, 0], sizes = [1, 32], strides = [1, 1]} : vector<8x32xf32> to vector<1x32xf32>
    %9 = vector.extract_strided_slice %2 {offsets = [3, 0], sizes = [1, 32], strides = [1, 1]} : vector<8x32xf32> to vector<1x32xf32>
    %10 = vector.extract_strided_slice %2 {offsets = [4, 0], sizes = [1, 1], strides = [1, 1]} : vector<8x32xf32> to vector<1x1xf32>
    %11 = arith.truncf %0 : vector<192x4xf32> to vector<192x4xbf16>
    %cst = arith.constant dense<0.000000e+00> : vector<192x4xf32>
    %12 = tpu.matmul %11, %3, %cst {dimension_numbers = #tpu.dot_dimension_numbers<[1], [0], [0], [1], [0, 0, 1, 1], [], []>} : vector<192x4xbf16>, vector<4x4xbf16>, vector<192x4xf32> -> vector<192x4xf32>
    %c0_5 = arith.constant 0 : index
    %c0_6 = arith.constant 0 : index
    %13 = vector.load %arg1[%c0_5, %c0_6] : memref<192x192xbf16, #tpu.memory_space<vmem>>, vector<192x192xbf16>
    %14 = arith.truncf %12 : vector<192x4xf32> to vector<192x4xbf16>
    %cst_7 = arith.constant dense<0.000000e+00> : vector<192x4xf32>
    %15 = tpu.matmul %13, %14, %cst_7 {dimension_numbers = #tpu.dot_dimension_numbers<[1], [0], [0], [1], [0, 0, 1, 1], [], []>} : vector<192x192xbf16>, vector<192x4xbf16>, vector<192x4xf32> -> vector<192x4xf32>
    %16 = vector.broadcast %6 : vector<1x4xf32> to vector<192x4xf32>
    %17 = arith.addf %15, %16 : vector<192x4xf32>
    %cst_8 = arith.constant 0.000000e+00 : f32
    %18 = vector.broadcast %cst_8 : f32 to vector<192x4xf32>
    %19 = arith.maximumf %17, %18 : vector<192x4xf32>
    %20 = arith.addf %19, %0 : vector<192x4xf32>
    %c0_9 = arith.constant 0 : index
    %c0_10 = arith.constant 0 : index
    %21 = vector.load %arg3[%c0_9, %c0_10] : memref<32x192xbf16, #tpu.memory_space<vmem>>, vector<32x192xbf16>
    %22 = arith.truncf %20 : vector<192x4xf32> to vector<192x4xbf16>
    %cst_11 = arith.constant dense<0.000000e+00> : vector<32x4xf32>
    %23 = tpu.matmul %21, %22, %cst_11 {dimension_numbers = #tpu.dot_dimension_numbers<[1], [0], [0], [1], [0, 0, 1, 1], [], []>} : vector<32x192xbf16>, vector<192x4xbf16>, vector<32x4xf32> -> vector<32x4xf32>
    %24 = arith.truncf %23 : vector<32x4xf32> to vector<32x4xbf16>
    %cst_12 = arith.constant dense<0.000000e+00> : vector<32x32xf32>
    %25 = tpu.matmul %24, %4, %cst_12 {dimension_numbers = #tpu.dot_dimension_numbers<[1], [0], [0], [1], [0, 0, 1, 1], [], []>} : vector<32x4xbf16>, vector<4x32xbf16>, vector<32x32xf32> -> vector<32x32xf32>
    %26 = vector.broadcast %7 : vector<1x32xf32> to vector<32x32xf32>
    %27 = arith.addf %25, %26 : vector<32x32xf32>
    %cst_13 = arith.constant 0.000000e+00 : f32
    %28 = vector.broadcast %cst_13 : f32 to vector<32x32xf32>
    %29 = arith.maximumf %27, %28 : vector<32x32xf32>
    %30 = arith.truncf %29 : vector<32x32xf32> to vector<32x32xbf16>
    %cst_14 = arith.constant dense<0.000000e+00> : vector<32x32xf32>
    %31 = tpu.matmul %30, %5, %cst_14 {dimension_numbers = #tpu.dot_dimension_numbers<[1], [0], [0], [1], [0, 0, 1, 1], [], []>} : vector<32x32xbf16>, vector<32x32xbf16>, vector<32x32xf32> -> vector<32x32xf32>
    %32 = vector.broadcast %8 : vector<1x32xf32> to vector<32x32xf32>
    %33 = arith.addf %31, %32 : vector<32x32xf32>
    %cst_15 = arith.constant 0.000000e+00 : f32
    %34 = vector.broadcast %cst_15 : f32 to vector<32x32xf32>
    %35 = arith.maximumf %33, %34 : vector<32x32xf32>
    %36 = vector.broadcast %9 : vector<1x32xf32> to vector<32x32xf32>
    %37 = arith.mulf %35, %36 : vector<32x32xf32>
    %cst_16 = arith.constant dense<0.000000e+00> : vector<32xf32>
    %38 = vector.multi_reduction <add>, %37, %cst_16 [1] : vector<32x32xf32> to vector<32xf32>
    %39 = vector.shape_cast %38 : vector<32xf32> to vector<32x1xf32>
    %40 = vector.broadcast %10 : vector<1x1xf32> to vector<32x1xf32>
    %41 = arith.addf %39, %40 : vector<32x1xf32>
    %42 = tpu.transpose %41, [1, 0] : vector<32x1xf32> -> vector<1x32xf32>
    %43 = vector.shape_cast %42 : vector<1x32xf32> to vector<1x1x32xf32>
    %c0_17 = arith.constant 0 : index
    %c0_18 = arith.constant 0 : index
    %c0_19 = arith.constant 0 : index
    %44 = vector.load %arg6[%c0_17, %c0_18, %c0_19] : memref<1x1x32xf32, #tpu.memory_space<vmem>>, vector<1x1x32xf32>
    tpu.vector_store %arg6[%c0_17, %c0_18, %c0_19], %43 {strides = array<i32>} : memref<1x1x32xf32, #tpu.memory_space<vmem>>, vector<1x1x32xf32>,
    return
  }
  func.func @transform_0(%arg0: i32) -> (i32, i32) {
    %c0_i32 = arith.constant 0 : i32
    %c0_i32_0 = arith.constant 0 : i32
    %c0_i32_1 = arith.constant 0 : i32
    return %c0_i32, %c0_i32_0 : i32, i32
  }
  func.func @transform_1(%arg0: i32) -> (i32, i32) {
    %c0_i32 = arith.constant 0 : i32
    %c0_i32_0 = arith.constant 0 : i32
    return %arg0, %c0_i32 : i32, i32
  }
  func.func @transform_2(%arg0: i32) -> (i32, i32) {
    %c0_i32 = arith.constant 0 : i32
    %c0_i32_0 = arith.constant 0 : i32
    return %arg0, %c0_i32 : i32, i32
  }
  func.func @transform_3(%arg0: i32) -> (i32, i32) {
    %c0_i32 = arith.constant 0 : i32
    %c0_i32_0 = arith.constant 0 : i32
    %c0_i32_1 = arith.constant 0 : i32
    return %c0_i32, %c0_i32_0 : i32, i32
  }
  func.func @transform_4(%arg0: i32) -> (i32, i32) {
    %c0_i32 = arith.constant 0 : i32
    %c0_i32_0 = arith.constant 0 : i32
    %c0_i32_1 = arith.constant 0 : i32
    return %c0_i32, %c0_i32_0 : i32, i32
  }
  func.func @transform_5(%arg0: i32) -> (i32, i32, i32) {
    %c0_i32 = arith.constant 0 : i32
    %c0_i32_0 = arith.constant 0 : i32
    %c0_i32_1 = arith.constant 0 : i32
    return %arg0, %c0_i32, %c0_i32_0 : i32, i32, i32
  }
}

</mosaic_0001>

<bundles_post_ra>
// kernel: gnn_critic1_apply.1
= control target key start
LH: loop header
LB: loop body
LE: loop exit
PB: predicated region body
PF: predicated region fallthrough
CT: control target
= control target key end

     0   :  { %vm102_vm0 = vcmask 1041408   ;;  %vm65_vm1 = vcmask 31744   ;;  %s1514_s0 = inlined_call_operand.vmem [shape: bf16[192,192], index: 0, kind: input, shape index: {}]   ;;  %s1515_s1 = inlined_call_operand.vmem [shape: f32[192,4], index: 1, kind: input, shape index: {}]   ;;  %s1516_s2 = inlined_call_operand.vmem [shape: bf16[32,192], index: 2, kind: input, shape index: {}]   ;;  %s1517_s3 = inlined_call_operand.vmem [shape: bf16[48,32], index: 3, kind: input, shape index: {}]   ;;  %s1518_s4 = inlined_call_operand.vmem [shape: f32[8,32], index: 4, kind: input, shape index: {}]   ;;  %s1519_s5 = inlined_call_operand.hbm [shape: f32[1,1,32], index: 5, kind: output, shape index: {}]  }
   0x1   :  { %v46_v0 = vld [vmem:[%s1517_s3] sm:$0xf]  ;;  %v1144_v2 = vld [vmem:[%s1515_s1 + $0x8] sm:$0xff]  ;;  %v1153_v5 = vld [vmem:[%s1515_s1 + $0x10] sm:$0xff] }
   0x2   :  { %v1139_v1 = vld [vmem:[%s1515_s1] sm:$0xff]  ;;  %1028 = vmatprep.subr.msk.bf16.mxu0 %vm102_vm0, %v46_v0  ;;  %v104_v3 = vsel %vm102_vm0, %v46_v0, 0  ;;  %v1158_v6 = vld [vmem:[%s1515_s1 + $0x18] sm:$0xff]  ;;  %v1170_v9 = vld [vmem:[%s1515_s1 + $0x28] sm:$0xff] }
   0x3   :  { %v53_v4 = vpack.c.bf16 %v1144_v2, %v1139_v1  ;;  %v1163_v7 = vld [vmem:[%s1515_s1 + $0x20] sm:$0xff]  ;;  %989 = vmatpush3.bf16.msra.mxu0 %v104_v3  ;;  %v54_v8 = vpack.c.bf16 %v1158_v6, %v1153_v5  ;;  %v1180_v11 = vld [vmem:[%s1515_s1 + $0x30] sm:$0xff]  ;;  %v1185_v12 = vld [vmem:[%s1515_s1 + $0x38] sm:$0xff] }
   0x4   :  { %v55_v10 = vpack.c.bf16 %v1170_v9, %v1163_v7  ;;  %v1190_v13 = vld [vmem:[%s1515_s1 + $0x40] sm:$0xff]  ;;  %v1195_v14 = vld [vmem:[%s1515_s1 + $0x48] sm:$0xff]  ;;  %v56_v15 = vpack.c.bf16 %v1185_v12, %v1180_v11  ;;  %v1204_v17 = vld [vmem:[%s1515_s1 + $0x50] sm:$0xff] }
   0x5   :  { %990 = vmatprep.mubr.msk.bf16.mxu0 %vm65_vm1, %v53_v4  ;;  %v57_v16 = vpack.c.bf16 %v1195_v14, %v1190_v13  ;;  %v1209_v18 = vld [vmem:[%s1515_s1 + $0x58] sm:$0xff]  ;;  %v1215_v19 = vld [vmem:[%s1515_s1 + $0x60] sm:$0xff]  ;;  %v1220_v20 = vld [vmem:[%s1515_s1 + $0x68] sm:$0xff] }
   0x6   :  { %991 = vmatmul.mubr.msk.bf16.vlgmr.msra.gmra.mrb[0].mxu0 %vm65_vm1, %v54_v8  ;;  %v58_v21 = vpack.c.bf16 %v1209_v18, %v1204_v17  ;;  %v59_v22 = vpack.c.bf16 %v1220_v20, %v1215_v19 }
   0x7   :  { %994 = vmatprep.mubr.msk.bf16.mxu0 %vm65_vm1, %v55_v10 }
   0xe   :  { %995 = vmatmul.mubr.msk.bf16.gmra.mrb[4].mxu0 %vm65_vm1, %v56_v15 }
   0xf   :  { %998 = vmatprep.mubr.msk.bf16.mxu0 %vm65_vm1, %v57_v16 }
  0x10   :  { %10 = vsyncpa [#allocation3], 0  ;;  %v1232_v23 = vld [vmem:[%s1515_s1 + $0x70] sm:$0xff]  ;;  %v1237_v24 = vld [vmem:[%s1515_s1 + $0x78] sm:$0xff]  ;;  %v1101_v38 = vmov 0   ;;  %vm383_vm2 = vcmask 523264  }
  0x11   :  { %v1242_v25 = vld [vmem:[%s1515_s1 + $0x80] sm:$0xff]  ;;  %v1247_v26 = vld [vmem:[%s1515_s1 + $0x88] sm:$0xff]  ;;  %v60_v27 = vpack.c.bf16 %v1237_v24, %v1232_v23  ;;  %v1258_v29 = vld [vmem:[%s1515_s1 + $0x90] sm:$0xff]  ;;  %420 = vmatprep.subr.bf16.mxu1 %v1101_v38  ;;  %637 = vmatprep.subr.bf16.mxu0 %v1101_v38  ;;  %vm772_vm3 = vcmask 261120   ;;  %vm892_vm4 = vcmask 253952  }
  0x12   :  { %v61_v28 = vpack.c.bf16 %v1247_v26, %v1242_v25  ;;  %v1263_v30 = vld [vmem:[%s1515_s1 + $0x98] sm:$0xff]  ;;  %v1268_v31 = vld [vmem:[%s1515_s1 + $0xa0] sm:$0xff]  ;;  %v1273_v32 = vld [vmem:[%s1515_s1 + $0xa8] sm:$0xff] }
  0x13   :  { %v62_v33 = vpack.c.bf16 %v1263_v30, %v1258_v29  ;;  %v63_v34 = vpack.c.bf16 %v1273_v32, %v1268_v31  ;;  %v1284_v35 = vld [vmem:[%s1515_s1 + $0xb0] sm:$0xff]  ;;  %v1289_v36 = vld [vmem:[%s1515_s1 + $0xb8] sm:$0xff]  ;;  %v1035_v39 = vld [vmem:[%s1514_s0 + $0x4] ss:$8 sps:$4 sm:$0xff]  }
  0x14   :  { %v64_v37 = vpack.c.bf16 %v1289_v36, %v1284_v35  ;;  %944 = vmatprep.mubr.msk.bf16.mxu1 %vm383_vm2, %v1035_v39  ;;  %v1038_v39 = vld [vmem:[%s1514_s0 + $0x10] ss:$8 sps:$4 sm:$0xff]  }
  0x16   :  { %999 = vmatmul.mubr.msk.bf16.gmra.mrb[8].mxu0 %vm65_vm1, %v58_v21 }
  0x17   :  { %1002 = vmatprep.mubr.msk.bf16.mxu0 %vm65_vm1, %v59_v22 }
  0x1e   :  { %1003 = vmatmul.mubr.msk.bf16.gmra.mrb[12].mxu0 %vm65_vm1, %v60_v27 }
  0x1f   :  { %1006 = vmatprep.mubr.msk.bf16.mxu0 %vm65_vm1, %v61_v28 }
  0x26   :  { %1007 = vmatmul.mubr.msk.bf16.gmra.mrb[16].mxu0 %vm65_vm1, %v62_v33 }
  0x27   :  { %1010 = vmatprep.mubr.msk.bf16.mxu0 %vm65_vm1, %v63_v34  ;;  %v1033_v34 = vld [vmem:[%s1514_s0] ss:$8 sps:$4 sm:$0xff]  }
  0x2e   :  { %1011 = vmatmul.mubr.msk.bf16.gmra.mrb[20].mxu0 %vm65_vm1, %v64_v37  ;;  %v1036_v37 = vld [vmem:[%s1514_s0 + $0x14] ss:$8 sps:$4 sm:$0xff]  }
  0xd9   :  { %v992_v40 = vpop.f32.mrb[0].mxu0 }
  0xda   :  { %v140_v41 = vpop.f32.mrb[1].mxu0 }
  0xdb   :  { %v993_v42 = vpop.f32.mrb[2].mxu0 }
  0xdc   :  { %v260_v43 = vpack.c.bf16 %v993_v42, %v992_v40  ;;  %v143_v44 = vpop.f32.mrb[3].mxu0  ;;  %v1039_v40 = vld [vmem:[%s1514_s0 + $0x24] ss:$8 sps:$4 sm:$0xff]   ;;  %v1042_v42 = vld [vmem:[%s1514_s0 + $0x34] ss:$8 sps:$4 sm:$0xff]  }
  0xdd   :  { %v259_v45 = vpack.c.bf16 %v143_v44, %v140_v41  ;;  %v1041_v41 = vld [vmem:[%s1514_s0 + $0x20] ss:$8 sps:$4 sm:$0xff]   ;;  %v1045_v44 = vld [vmem:[%s1514_s0 + $0x44] ss:$8 sps:$4 sm:$0xff]  }
  0xdf   :  { %421 = vmatpush1.bf16.msra.mxu1 %v259_v45  ;;  %v1047_v45 = vld [vmem:[%s1514_s0 + $0x40] ss:$8 sps:$4 sm:$0xff]  }
  0xe0   :  { %422 = vmatprep.subr.bf16.mxu1 %v1101_v38 }
  0xe1   :  { %v996_v46 = vpop.f32.mrb[4].mxu0 }
  0xe2   :  { %v156_v47 = vpop.f32.mrb[5].mxu0 }
  0xe3   :  { %v997_v48 = vpop.f32.mrb[6].mxu0  ;;  %423 = vmatpush1.bf16.msra.mxu1 %v260_v43  ;;  %v1044_v43 = vld [vmem:[%s1514_s0 + $0x30] ss:$8 sps:$4 sm:$0xff]  }
  0xe4   :  { %v262_v49 = vpack.c.bf16 %v997_v48, %v996_v46  ;;  %v159_v50 = vpop.f32.mrb[7].mxu0  ;;  %424 = vmatprep.subr.bf16.mxu1 %v1101_v38  ;;  %v1048_v46 = vld [vmem:[%s1514_s0 + $0x54] ss:$8 sps:$4 sm:$0xff]   ;;  %v1051_v48 = vld [vmem:[%s1514_s0 + $0x64] ss:$8 sps:$4 sm:$0xff]  }
  0xe5   :  { %v261_v51 = vpack.c.bf16 %v159_v50, %v156_v47  ;;  %v1050_v47 = vld [vmem:[%s1514_s0 + $0x50] ss:$8 sps:$4 sm:$0xff]   ;;  %v1054_v50 = vld [vmem:[%s1514_s0 + $0x74] ss:$8 sps:$4 sm:$0xff]  }
  0xe7   :  { %425 = vmatpush1.bf16.msra.mxu1 %v261_v51  ;;  %v1056_v51 = vld [vmem:[%s1514_s0 + $0x70] ss:$8 sps:$4 sm:$0xff]  }
  0xe8   :  { %426 = vmatprep.subr.bf16.mxu1 %v1101_v38 }
  0xe9   :  { %v1000_v52 = vpop.f32.mrb[8].mxu0 }
  0xea   :  { %v172_v53 = vpop.f32.mrb[9].mxu0 }
  0xeb   :  { %v1001_v54 = vpop.f32.mrb[10].mxu0  ;;  %427 = vmatpush1.bf16.msra.mxu1 %v262_v49  ;;  %v1053_v49 = vld [vmem:[%s1514_s0 + $0x60] ss:$8 sps:$4 sm:$0xff]  }
  0xec   :  { %v264_v55 = vpack.c.bf16 %v1001_v54, %v1000_v52  ;;  %v175_v56 = vpop.f32.mrb[11].mxu0  ;;  %428 = vmatprep.subr.bf16.mxu1 %v1101_v38  ;;  %v1057_v52 = vld [vmem:[%s1514_s0 + $0x84] ss:$8 sps:$4 sm:$0xff]   ;;  %v1060_v54 = vld [vmem:[%s1514_s0 + $0x94] ss:$8 sps:$4 sm:$0xff]  }
  0xed   :  { %v263_v57 = vpack.c.bf16 %v175_v56, %v172_v53  ;;  %v1059_v53 = vld [vmem:[%s1514_s0 + $0x80] ss:$8 sps:$4 sm:$0xff]   ;;  %v1063_v56 = vld [vmem:[%s1514_s0 + $0xa4] ss:$8 sps:$4 sm:$0xff]  }
  0xef   :  { %429 = vmatpush1.bf16.msra.mxu1 %v263_v57  ;;  %v1065_v57 = vld [vmem:[%s1514_s0 + $0xa0] ss:$8 sps:$4 sm:$0xff]  }
  0xf0   :  { %430 = vmatprep.subr.bf16.mxu1 %v1101_v38 }
  0xf1   :  { %v1004_v58 = vpop.f32.mrb[12].mxu0 }
  0xf2   :  { %v188_v59 = vpop.f32.mrb[13].mxu0 }
  0xf3   :  { %v1005_v60 = vpop.f32.mrb[14].mxu0  ;;  %431 = vmatpush1.bf16.msra.mxu1 %v264_v55  ;;  %v1062_v55 = vld [vmem:[%s1514_s0 + $0x90] ss:$8 sps:$4 sm:$0xff]  }
  0xf4   :  { %v266_v61 = vpack.c.bf16 %v1005_v60, %v1004_v58  ;;  %v191_v62 = vpop.f32.mrb[15].mxu0  ;;  %432 = vmatprep.subr.bf16.mxu1 %v1101_v38  ;;  %v1066_v58 = vld [vmem:[%s1514_s0 + $0xb4] ss:$8 sps:$4 sm:$0xff]   ;;  %v1071_v60 = vld [vmem:[%s1516_s2 + $0x4] ss:$8 sps:$4 sm:$0xff]  }
  0xf5   :  { %v265_v63 = vpack.c.bf16 %v191_v62, %v188_v59  ;;  %v1068_v59 = vld [vmem:[%s1514_s0 + $0xb0] ss:$8 sps:$4 sm:$0xff]   ;;  %960 = vmatprep.mubr.msk.bf16.mxu0 %vm383_vm2, %v1071_v60 }
  0xf7   :  { %433 = vmatpush1.bf16.msra.mxu1 %v265_v63 }
  0xf8   :  { %434 = vmatprep.subr.bf16.mxu1 %v1101_v38 }
  0xf9   :  { %v1008_v0 = vpop.f32.mrb[16].mxu0 }
  0xfa   :  { %v204_v3 = vpop.f32.mrb[17].mxu0 }
  0xfb   :  { %v1009_v4 = vpop.f32.mrb[18].mxu0  ;;  %435 = vmatpush1.bf16.msra.mxu1 %v266_v61  ;;  %v271_v61 = vlaneseq }
  0xfc   :  { %v268_v8 = vpack.c.bf16 %v1009_v4, %v1008_v0  ;;  %v207_v10 = vpop.f32.mrb[19].mxu0  ;;  %436 = vmatprep.subr.bf16.mxu1 %v1101_v38  ;;  %v1401_v0 = vld [vmem:[%s1518_s4] sm:$0xff] }
  0xfd   :  { %v267_v15 = vpack.c.bf16 %v207_v10, %v204_v3  ;;  %v1395_v62 = vshrl.u32 %v271_v61, 7 }
  0xff   :  { %437 = vmatpush1.bf16.msra.mxu1 %v267_v15  ;;  %v273_v63 = vsub.s32 0, %v1395_v62 }
 0x100   :  { %438 = vmatprep.subr.bf16.mxu1 %v1101_v38 }
 0x101   :  { %v1012_v16 = vpop.f32.mrb[20].mxu0  ;;  %v1404_v3 = vrot.slane %v1401_v0, %v273_v63 }
 0x102   :  { %v220_v21 = vpop.f32.mrb[21].mxu0 }
 0x103   :  { %v1013_v22 = vpop.f32.mrb[22].mxu0  ;;  %439 = vmatpush1.bf16.msra.mxu1 %v268_v8 }
 0x104   :  { %v270_v27 = vpack.c.bf16 %v1013_v22, %v1012_v16  ;;  %v223_v28 = vpop.f32.mrb[23].mxu0  ;;  %440 = vmatprep.subr.bf16.mxu1 %v1101_v38 }
 0x105   :  { %v269_v33 = vpack.c.bf16 %v223_v28, %v220_v21 }
 0x107   :  { %441 = vmatpush1.bf16.msra.mxu1 %v269_v33 }
 0x108   :  { %442 = vmatprep.subr.bf16.mxu1 %v1101_v38 }
 0x10b   :  { %443 = vmatpush1.bf16.msra.mxu1 %v270_v27 }
 0x10e   :  { %453 = vmatmul.mubr.bf16.vlgmr.msra.gmra.mrb[0].mxu1 %v1033_v34 }
 0x10f   :  { %945 = vmatprep.mubr.msk.bf16.mxu1 %vm383_vm2, %v1036_v37 }
 0x116   :  { %461 = vmatmul.mubr.bf16.gmra.mrb[4].mxu1 %v1038_v39 }
 0x117   :  { %946 = vmatprep.mubr.msk.bf16.mxu1 %vm383_vm2, %v1039_v40 }
 0x11e   :  { %469 = vmatmul.mubr.bf16.gmra.mrb[8].mxu1 %v1041_v41 }
 0x11f   :  { %947 = vmatprep.mubr.msk.bf16.mxu1 %vm383_vm2, %v1042_v42 }
 0x126   :  { %477 = vmatmul.mubr.bf16.gmra.mrb[12].mxu1 %v1044_v43 }
 0x127   :  { %948 = vmatprep.mubr.msk.bf16.mxu1 %vm383_vm2, %v1045_v44 }
 0x12e   :  { %485 = vmatmul.mubr.bf16.gmra.mrb[16].mxu1 %v1047_v45 }
 0x12f   :  { %949 = vmatprep.mubr.msk.bf16.mxu1 %vm383_vm2, %v1048_v46 }
 0x136   :  { %493 = vmatmul.mubr.bf16.gmra.mrb[20].mxu1 %v1050_v47 }
 0x137   :  { %950 = vmatprep.mubr.msk.bf16.mxu1 %vm383_vm2, %v1051_v48 }
 0x13e   :  { %501 = vmatmul.mubr.bf16.gmra.mrb[24].mxu1 %v1053_v49 }
 0x13f   :  { %951 = vmatprep.mubr.msk.bf16.mxu1 %vm383_vm2, %v1054_v50 }
 0x146   :  { %509 = vmatmul.mubr.bf16.gmra.mrb[28].mxu1 %v1056_v51 }
 0x147   :  { %952 = vmatprep.mubr.msk.bf16.mxu1 %vm383_vm2, %v1057_v52 }
 0x14e   :  { %517 = vmatmul.mubr.bf16.gmra.mrb[32].mxu1 %v1059_v53 }
 0x14f   :  { %953 = vmatprep.mubr.msk.bf16.mxu1 %vm383_vm2, %v1060_v54 }
 0x156   :  { %525 = vmatmul.mubr.bf16.gmra.mrb[36].mxu1 %v1062_v55 }
 0x157   :  { %954 = vmatprep.mubr.msk.bf16.mxu1 %vm383_vm2, %v1063_v56 }
 0x15e   :  { %533 = vmatmul.mubr.bf16.gmra.mrb[40].mxu1 %v1065_v57 }
 0x15f   :  { %955 = vmatprep.mubr.msk.bf16.mxu1 %vm383_vm2, %v1066_v58 }
 0x166   :  { %541 = vmatmul.mubr.bf16.gmra.mrb[44].mxu1 %v1068_v59 }
 0x1e1   :  { %v454_v4 = vpop.f32.mrb[0].mxu1 }
 0x1e2   :  { %v455_v8 = vadd.f32 %v454_v4, %v1404_v3  ;;  %v456_v10 = vpop.f32.mrb[1].mxu1 }
 0x1e3   :  { %v457_v15 = vpop.f32.mrb[2].mxu1 }
 0x1e4   :  { %v549_v16 = vmax.f32 %v455_v8, 0.0  ;;  %v458_v21 = vadd.f32 %v457_v15, %v1404_v3  ;;  %v459_v22 = vpop.f32.mrb[3].mxu1 }
 0x1e6   :  { %v550_v27 = vmax.f32 %v458_v21, 0.0  ;;  %v573_v28 = vadd.f32 %v549_v16, %v1139_v1 }
 0x1e8   :  { %v574_v33 = vadd.f32 %v550_v27, %v1144_v2 }
 0x1e9   :  { %v462_v34 = vpop.f32.mrb[4].mxu1 }
 0x1ea   :  { %v601_v37 = vpack.c.bf16 %v574_v33, %v573_v28  ;;  %v463_v39 = vadd.f32 %v462_v34, %v1404_v3  ;;  %v464_v40 = vpop.f32.mrb[5].mxu1 }
 0x1eb   :  { %v465_v41 = vpop.f32.mrb[6].mxu1 }
 0x1ec   :  { %v551_v42 = vmax.f32 %v463_v39, 0.0  ;;  %v466_v43 = vadd.f32 %v465_v41, %v1404_v3  ;;  %v467_v44 = vpop.f32.mrb[7].mxu1  ;;  %638 = vmatpush1.bf16.msra.mxu0 %v601_v37 }
 0x1ed   :  { %639 = vmatprep.subr.bf16.mxu0 %v1101_v38 }
 0x1ee   :  { %v552_v45 = vmax.f32 %v466_v43, 0.0  ;;  %v575_v46 = vadd.f32 %v551_v42, %v1153_v5 }
 0x1f0   :  { %v576_v1 = vadd.f32 %v552_v45, %v1158_v6 }
 0x1f1   :  { %v470_v47 = vpop.f32.mrb[8].mxu1 }
 0x1f2   :  { %v602_v2 = vpack.c.bf16 %v576_v1, %v575_v46  ;;  %v471_v48 = vadd.f32 %v470_v47, %v1404_v3  ;;  %v472_v49 = vpop.f32.mrb[9].mxu1 }
 0x1f3   :  { %v473_v50 = vpop.f32.mrb[10].mxu1 }
 0x1f4   :  { %v553_v51 = vmax.f32 %v471_v48, 0.0  ;;  %v474_v52 = vadd.f32 %v473_v50, %v1404_v3  ;;  %v475_v53 = vpop.f32.mrb[11].mxu1  ;;  %640 = vmatpush1.bf16.msra.mxu0 %v602_v2 }
 0x1f5   :  { %641 = vmatprep.subr.bf16.mxu0 %v1101_v38 }
 0x1f6   :  { %v554_v54 = vmax.f32 %v474_v52, 0.0  ;;  %v577_v55 = vadd.f32 %v553_v51, %v1163_v7 }
 0x1f8   :  { %v578_v5 = vadd.f32 %v554_v54, %v1170_v9 }
 0x1f9   :  { %v478_v56 = vpop.f32.mrb[12].mxu1 }
 0x1fa   :  { %v603_v6 = vpack.c.bf16 %v578_v5, %v577_v55  ;;  %v479_v57 = vadd.f32 %v478_v56, %v1404_v3  ;;  %v480_v58 = vpop.f32.mrb[13].mxu1 }
 0x1fb   :  { %v481_v59 = vpop.f32.mrb[14].mxu1 }
 0x1fc   :  { %v555_v60 = vmax.f32 %v479_v57, 0.0  ;;  %v482_v61 = vadd.f32 %v481_v59, %v1404_v3  ;;  %v483_v63 = vpop.f32.mrb[15].mxu1  ;;  %642 = vmatpush1.bf16.msra.mxu0 %v603_v6 }
 0x1fd   :  { %643 = vmatprep.subr.bf16.mxu0 %v1101_v38 }
 0x1fe   :  { %v556_v4 = vmax.f32 %v482_v61, 0.0  ;;  %v579_v8 = vadd.f32 %v555_v60, %v1180_v11 }
 0x200   :  { %v580_v7 = vadd.f32 %v556_v4, %v1185_v12 }
 0x201   :  { %v486_v10 = vpop.f32.mrb[16].mxu1 }
 0x202   :  { %v604_v9 = vpack.c.bf16 %v580_v7, %v579_v8  ;;  %v487_v15 = vadd.f32 %v486_v10, %v1404_v3  ;;  %v488_v16 = vpop.f32.mrb[17].mxu1 }
 0x203   :  { %v489_v21 = vpop.f32.mrb[18].mxu1 }
 0x204   :  { %v557_v22 = vmax.f32 %v487_v15, 0.0  ;;  %v490_v27 = vadd.f32 %v489_v21, %v1404_v3  ;;  %v491_v28 = vpop.f32.mrb[19].mxu1  ;;  %644 = vmatpush1.bf16.msra.mxu0 %v604_v9 }
 0x205   :  { %645 = vmatprep.subr.bf16.mxu0 %v1101_v38 }
 0x206   :  { %v558_v33 = vmax.f32 %v490_v27, 0.0  ;;  %v581_v34 = vadd.f32 %v557_v22, %v1190_v13 }
 0x208   :  { %v582_v11 = vadd.f32 %v558_v33, %v1195_v14 }
 0x209   :  { %v494_v37 = vpop.f32.mrb[20].mxu1 }
 0x20a   :  { %v605_v12 = vpack.c.bf16 %v582_v11, %v581_v34  ;;  %v495_v39 = vadd.f32 %v494_v37, %v1404_v3  ;;  %v496_v40 = vpop.f32.mrb[21].mxu1 }
 0x20b   :  { %v497_v41 = vpop.f32.mrb[22].mxu1 }
 0x20c   :  { %v559_v42 = vmax.f32 %v495_v39, 0.0  ;;  %v498_v43 = vadd.f32 %v497_v41, %v1404_v3  ;;  %v499_v44 = vpop.f32.mrb[23].mxu1  ;;  %646 = vmatpush1.bf16.msra.mxu0 %v605_v12 }
 0x20d   :  { %647 = vmatprep.subr.bf16.mxu0 %v1101_v38 }
 0x20e   :  { %v560_v45 = vmax.f32 %v498_v43, 0.0  ;;  %v583_v46 = vadd.f32 %v559_v42, %v1204_v17 }
 0x210   :  { %v584_v13 = vadd.f32 %v560_v45, %v1209_v18 }
 0x211   :  { %v502_v1 = vpop.f32.mrb[24].mxu1 }
 0x212   :  { %v606_v14 = vpack.c.bf16 %v584_v13, %v583_v46  ;;  %v503_v47 = vadd.f32 %v502_v1, %v1404_v3  ;;  %v504_v2 = vpop.f32.mrb[25].mxu1 }
 0x213   :  { %v505_v48 = vpop.f32.mrb[26].mxu1 }
 0x214   :  { %v561_v49 = vmax.f32 %v503_v47, 0.0  ;;  %v506_v50 = vadd.f32 %v505_v48, %v1404_v3  ;;  %v507_v51 = vpop.f32.mrb[27].mxu1  ;;  %648 = vmatpush1.bf16.msra.mxu0 %v606_v14 }
 0x215   :  { %649 = vmatprep.subr.bf16.mxu0 %v1101_v38 }
 0x216   :  { %v562_v52 = vmax.f32 %v506_v50, 0.0  ;;  %v585_v53 = vadd.f32 %v561_v49, %v1215_v19 }
 0x218   :  { %v586_v17 = vadd.f32 %v562_v52, %v1220_v20 }
 0x219   :  { %v510_v54 = vpop.f32.mrb[28].mxu1 }
 0x21a   :  { %v607_v18 = vpack.c.bf16 %v586_v17, %v585_v53  ;;  %v511_v55 = vadd.f32 %v510_v54, %v1404_v3  ;;  %v512_v5 = vpop.f32.mrb[29].mxu1  ;;  %v1069_v17 = vld [vmem:[%s1516_s2] ss:$8 sps:$4 sm:$0xff]  }
 0x21b   :  { %v513_v56 = vpop.f32.mrb[30].mxu1 }
 0x21c   :  { %v563_v6 = vmax.f32 %v511_v55, 0.0  ;;  %v514_v57 = vadd.f32 %v513_v56, %v1404_v3  ;;  %v515_v58 = vpop.f32.mrb[31].mxu1  ;;  %650 = vmatpush1.bf16.msra.mxu0 %v607_v18 }
 0x21d   :  { %651 = vmatprep.subr.bf16.mxu0 %v1101_v38 }
 0x21e   :  { %v564_v59 = vmax.f32 %v514_v57, 0.0  ;;  %v587_v60 = vadd.f32 %v563_v6, %v1232_v23 }
 0x220   :  { %v588_v19 = vadd.f32 %v564_v59, %v1237_v24 }
 0x221   :  { %v518_v61 = vpop.f32.mrb[32].mxu1 }
 0x222   :  { %v608_v20 = vpack.c.bf16 %v588_v19, %v587_v60  ;;  %v519_v63 = vadd.f32 %v518_v61, %v1404_v3  ;;  %v520_v4 = vpop.f32.mrb[33].mxu1  ;;  %v1075_v60 = vld [vmem:[%s1517_s3 + $0x8] sm:$0xff]   ;;  %v1076_v19 = vld [vmem:[%s1517_s3 + $0x10] sm:$0xff]   ;;  %v690_v61 = vsub.s32 1, %v1395_v62 }
 0x223   :  { %v521_v8 = vpop.f32.mrb[34].mxu1 }
 0x224   :  { %v565_v7 = vmax.f32 %v519_v63, 0.0  ;;  %v522_v10 = vadd.f32 %v521_v8, %v1404_v3  ;;  %v523_v9 = vpop.f32.mrb[35].mxu1  ;;  %652 = vmatpush1.bf16.msra.mxu0 %v608_v20  ;;  %v691_v20 = vrot.slane %v1401_v0, %v690_v61 }
 0x225   :  { %653 = vmatprep.subr.bf16.mxu0 %v1101_v38 }
 0x226   :  { %v566_v15 = vmax.f32 %v522_v10, 0.0  ;;  %v589_v16 = vadd.f32 %v565_v7, %v1242_v25 }
 0x228   :  { %v590_v23 = vadd.f32 %v566_v15, %v1247_v26 }
 0x229   :  { %v526_v21 = vpop.f32.mrb[36].mxu1 }
 0x22a   :  { %v609_v24 = vpack.c.bf16 %v590_v23, %v589_v16  ;;  %v527_v22 = vadd.f32 %v526_v21, %v1404_v3  ;;  %v528_v27 = vpop.f32.mrb[37].mxu1 }
 0x22b   :  { %v529_v28 = vpop.f32.mrb[38].mxu1 }
 0x22c   :  { %v567_v33 = vmax.f32 %v527_v22, 0.0  ;;  %v530_v34 = vadd.f32 %v529_v28, %v1404_v3  ;;  %v531_v11 = vpop.f32.mrb[39].mxu1  ;;  %654 = vmatpush1.bf16.msra.mxu0 %v609_v24 }
 0x22d   :  { %655 = vmatprep.subr.bf16.mxu0 %v1101_v38  ;;  %v834_v11 = vsub.s32 3, %v1395_v62 }
 0x22e   :  { %v568_v37 = vmax.f32 %v530_v34, 0.0  ;;  %v591_v12 = vadd.f32 %v567_v33, %v1258_v29  ;;  %v758_v33 = vsub.s32 2, %v1395_v62 }
 0x230   :  { %v592_v25 = vadd.f32 %v568_v37, %v1263_v30  ;;  %v759_v34 = vrot.slane %v1401_v0, %v758_v33 }
 0x231   :  { %v534_v39 = vpop.f32.mrb[40].mxu1 }
 0x232   :  { %v610_v26 = vpack.c.bf16 %v592_v25, %v591_v12  ;;  %v535_v40 = vadd.f32 %v534_v39, %v1404_v3  ;;  %v536_v41 = vpop.f32.mrb[41].mxu1  ;;  %v835_v39 = vrot.slane %v1401_v0, %v834_v11 }
 0x233   :  { %v537_v42 = vpop.f32.mrb[42].mxu1 }
 0x234   :  { %v569_v43 = vmax.f32 %v535_v40, 0.0  ;;  %v538_v44 = vadd.f32 %v537_v42, %v1404_v3  ;;  %v539_v45 = vpop.f32.mrb[43].mxu1  ;;  %656 = vmatpush1.bf16.msra.mxu0 %v610_v26 }
 0x235   :  { %657 = vmatprep.subr.bf16.mxu0 %v1101_v38 }
 0x236   :  { %v570_v46 = vmax.f32 %v538_v44, 0.0  ;;  %v593_v13 = vadd.f32 %v569_v43, %v1268_v31 }
 0x238   :  { %v594_v29 = vadd.f32 %v570_v46, %v1273_v32  ;;  %v47_v32 = vld [vmem:[%s1517_s3 + $0x4] sm:$0xf]  ;;  %s1102_s3 = smov [#allocation2]  }
 0x239   :  { %v542_v1 = vpop.f32.mrb[44].mxu1  ;;  %s900_s26 = sshll.u32 %s1102_s3, 4  ;;  %s901_s26 = int_to_ptr.vmem [resolvable:$true] %s900_s26 }
 0x23a   :  { %v611_v30 = vpack.c.bf16 %v594_v29, %v593_v13  ;;  %v543_v14 = vadd.f32 %v542_v1, %v1404_v3  ;;  %v544_v47 = vpop.f32.mrb[45].mxu1  ;;  %s1077_s27 = scalar_lea.vmem %s901_s26, 16  ;;  %s1081_s28 = scalar_lea.vmem %s901_s26, 32 }
 0x23b   :  { %v545_v2 = vpop.f32.mrb[46].mxu1  ;;  %p1078_p0 = scmp.ne.s32.totalorder %s901_s26, %s1077_s27  ;;  %p1082_p1 = scmp.lt.s32.totalorder %s901_s26, %s901_s26 }
 0x23c   :  { %v571_v48 = vmax.f32 %v543_v14, 0.0  ;;  %v546_v49 = vadd.f32 %v545_v2, %v1404_v3  ;;  %v547_v50 = vpop.f32.mrb[47].mxu1  ;;  %658 = vmatpush1.bf16.msra.mxu0 %v611_v30  ;;  %v1072_v3 = vld [vmem:[%s1516_s2 + $0x14] ss:$8 sps:$4 sm:$0xff]   ;;  %p1083_p2 = scmp.lt.s32.totalorder %s1081_s28, %s1077_s27 }
 0x23d   :  { %659 = vmatprep.subr.bf16.mxu0 %v1101_v38  ;;  %v854_v50 = vsub.s32 4, %v1395_v62 }
 0x23e   :  { %v572_v51 = vmax.f32 %v546_v49, 0.0  ;;  %v595_v52 = vadd.f32 %v571_v48, %v1284_v35  ;;  %v699_v35 = vsel %vm102_vm0, %v47_v32, 0  ;;  %p1084_p3 = por %p1083_p2, %p1082_p1 }
 0x240   :  { %v596_v31 = vadd.f32 %v572_v51, %v1289_v36  ;;  %v1074_v36 = vld [vmem:[%s1516_s2 + $0x10] ss:$8 sps:$4 sm:$0xff]   ;;  %v855_v51 = vrot.slane %v1401_v0, %v854_v50  ;;  %p1085_p4 = pnand %p1084_p3, %p1078_p0 }
 0x242   :  { %v612_v53 = vpack.c.bf16 %v596_v31, %v595_v52 }
 0x244   :  { %660 = vmatpush1.bf16.msra.mxu0 %v612_v53 }
 0x245   :  { %1029 = vmatprep.subr.msk.bf16.mxu0 %vm102_vm0, %v47_v32 }
 0x247   :  { %670 = vmatmul.mubr.bf16.vlgmr.msra.gmra.mrb[24].mxu0 %v1069_v17 }
 0x248   :  { %961 = vmatprep.mubr.msk.bf16.mxu0 %vm383_vm2, %v1072_v3  ;;  %1015 = vmatpush3.bf16.msra.mxu0 %v699_v35 }
 0x249   :  { %1020 = vmatprep.subr.bf16.mxu0 %v1075_v60 }
 0x24f   :  { %678 = vmatmul.mubr.bf16.gmra.mrb[28].mxu0 %v1074_v36 }
 0x31a   :  { %v671_v38 = vpop.f32.mrb[24].mxu0 }
 0x31b   :  { %v673_v54 = vpop.f32.mrb[25].mxu0 }
 0x31c   :  { %v674_v18 = vpop.f32.mrb[26].mxu0 }
 0x31d   :  { %v686_v55 = vpack.c.bf16 %v674_v18, %v671_v38  ;;  %v676_v5 = vpop.f32.mrb[27].mxu0 }
 0x31f   :  { %1016 = vmatprep.mubr.msk.bf16.mxu0 %vm65_vm1, %v686_v55 }
 0x322   :  { %v679_v56 = vpop.f32.mrb[28].mxu0 }
 0x323   :  { %v681_v6 = vpop.f32.mrb[29].mxu0 }
 0x324   :  { %v682_v57 = vpop.f32.mrb[30].mxu0 }
 0x325   :  { %v687_v58 = vpack.c.bf16 %v682_v57, %v679_v56  ;;  %v684_v59 = vpop.f32.mrb[31].mxu0 }
 0x327   :  { %1017 = vmatmul.mubr.msk.bf16.vlgmr.msra.gmra.mrb[32].mxu0 %vm65_vm1, %v687_v58 }
 0x328   :  { %1021 = vmatpush3.bf16.msra.mxu0 %v1075_v60 }
 0x329   :  { %1022 = vmatprep.subr.bf16.mxu0 %v1076_v19 }
 0x32c   :  { %1023 = vmatpush3.bf16.msra.mxu0 %v1076_v19 }
 0x3fa   :  { %v1018_v63 = vpop.f32.mrb[32].mxu0 }
 0x3fb   :  { %v744_v4 = vadd.f32 %v1018_v63, %v691_v20  ;;  %v735_v8 = vpop.f32.mrb[33].mxu0 }
 0x3fc   :  { %v736_v7 = vadd.f32 %v735_v8, %v691_v20  ;;  %v1019_v10 = vpop.f32.mrb[34].mxu0 }
 0x3fd   :  { %v747_v9 = vadd.f32 %v1019_v10, %v691_v20  ;;  %v738_v15 = vpop.f32.mrb[35].mxu0  ;;  %v752_v23 = vmax.f32 %v744_v4, 0.0 }
 0x3fe   :  { %v739_v16 = vadd.f32 %v738_v15, %v691_v20  ;;  %v750_v24 = vmax.f32 %v736_v7, 0.0 }
 0x3ff   :  { %v753_v21 = vmax.f32 %v747_v9, 0.0 }
 0x400   :  { %v751_v22 = vmax.f32 %v739_v16, 0.0 }
 0x401   :  { %v755_v27 = vpack.c.bf16 %v753_v21, %v752_v23 }
 0x402   :  { %v754_v28 = vpack.c.bf16 %v751_v22, %v750_v24 }
 0x404   :  { %1024 = vmatprep.mubr.msk.bf16.mxu0 %vm772_vm3, %v754_v28 }
 0x405   :  { %1025 = vmatmul.mubr.msk.bf16.vlgmr.msra.gmra.mrb[36].mxu0 %vm772_vm3, %v755_v27 }
 0x4d8   :  { %v1026_v37 = vpop.f32.mrb[36].mxu0 }
 0x4d9   :  { %v822_v12 = vadd.f32 %v1026_v37, %v759_v34  ;;  %v813_v25 = vpop.f32.mrb[37].mxu0 }
 0x4da   :  { %v814_v26 = vadd.f32 %v813_v25, %v759_v34  ;;  %v1027_v40 = vpop.f32.mrb[38].mxu0 }
 0x4db   :  { %v830_v41 = vmax.f32 %v822_v12, 0.0  ;;  %v825_v42 = vadd.f32 %v1027_v40, %v759_v34  ;;  %v816_v43 = vpop.f32.mrb[39].mxu0 }
 0x4dc   :  { %v828_v44 = vmax.f32 %v814_v26, 0.0  ;;  %v817_v45 = vadd.f32 %v816_v43, %v759_v34 }
 0x4dd   :  { %v831_v46 = vmax.f32 %v825_v42, 0.0  ;;  %v838_v13 = vmul.f32 %v835_v39, %v830_v41 }
 0x4de   :  { %v829_v29 = vmax.f32 %v817_v45, 0.0  ;;  %v836_v1 = vmul.f32 %v835_v39, %v828_v44 }
 0x4df   :  { %v846_v30 = vsel %vm772_vm3, %v838_v13, 0.0  ;;  %v839_v14 = vmul.f32 %v835_v39, %v831_v46 }
 0x4e0   :  { %847 = vadd.xlane.f32.xlu1 %v846_v30  ;;  %v840_v47 = vsel %vm772_vm3, %v836_v1, 0.0  ;;  %v837_v2 = vmul.f32 %v835_v39, %v829_v29 }
 0x4e1   :  { %841 = vadd.xlane.f32.xlu0 %v840_v47  ;;  %v849_v48 = vsel %vm772_vm3, %v839_v14, 0.0 }
 0x4e2   :  { %v843_v49 = vsel %vm772_vm3, %v837_v2, 0.0 }
 0x4e4   :  { %850 = vadd.xlane.f32.xlu1 %v849_v48 }
 0x4e5   :  { %844 = vadd.xlane.f32.xlu0 %v843_v49 }
 0x56d   :  { %v848_v53 = vpop.xlane.xlu1 %847 }
 0x56e   :  { %v842_v52 = vpop.xlane.xlu0 %841  ;;  %v858_v3 = vadd.f32 %v855_v51, %v848_v53 }
 0x56f   :  { %v856_v31 = vadd.f32 %v855_v51, %v842_v52 }
 0x571   :  { %860 = vxpose.xlu0.b32.start [1/4] (short) (narrow) %v856_v31, 8  ;;  %v851_v35 = vpop.xlane.xlu1 %850 }
 0x572   :  { %v845_v32 = vpop.xlane.xlu0 %844  ;;  %v859_v36 = vadd.f32 %v855_v51, %v851_v35 }
 0x573   :  { %v857_v17 = vadd.f32 %v855_v51, %v845_v32 }
 0x575   :  { %861 = vxpose.xlu0.b32.cont [2/4] (short) (narrow) %v857_v17, 8 }
 0x579   :  { %862 = vxpose.xlu0.b32.cont [3/4] (short) (narrow) %v858_v3, 8 }
 0x57d   :  { %863 = vxpose.xlu0.b32.end [4/4] (short) (narrow) %v859_v36, 8 }
 0x5f1   :  { %v876_v38 = vpop.trf.xlu0 }
 0x5f2   :  { %893 = vst.msk [vmem:[#allocation2] sm:$0x1] %vm892_vm4, %v876_v38 }
 0x5f3   :  { %1088 = shalt.err (!%p1085_p4)
}
 0x5f4   :  { %s1089_s6 = scalar_lea.hbm %s1519_s5, 16 }
 0x5f5   :  { %p1090_p5 = scmp.ne.s32.totalorder %s1519_s5, %s1089_s6  ;;  %p1093_p6 = scmp.lt.u32.totalorder %s1089_s6, %s1519_s5 }
 0x5f7   :  { %p1095_p7 = pnand %p1093_p6, %p1090_p5 }
 0x5f9   :  { %1098 = shalt.err (!%p1095_p7)
}
 0x5fa   :  { %903 = dma.vmem_to_hbm [thread:$0]  %s901_s26, 16, %s1519_s5, [#allocation3]  }
 0x5fb   :  { %1099 = dma.done.wait [#allocation3], 16  }
 0x5fc   :  { %1100 = vsyncadd [#allocation3], 4294967280 }
 0x5fd   :  { %907 = vsyncpa [#allocation3], 1 }

</bundles_post_ra>
